<compile_context>
chip_gen: v7x
topology: tpu7x:2x2x1
jax: 0.10.0
libtpu: 0.0.40
codegen_flags: <defaults>
</compile_context>

<pallas_src>
import math
import functools

import jax
import jax.numpy as jnp
from jax.experimental import pallas as pl
from jax.experimental.pallas import tpu as pltpu


def make_sinusoidal_pe(seq_len: int, d_model: int, dtype=jnp.float32) -> jnp.ndarray:
    """Deterministic buffer, identical to the module __init__ (built once,
    already in the compute dtype so there is no per-call cast)."""
    position = jnp.arange(seq_len, dtype=jnp.float32)[:, None]
    div_term = jnp.exp(
        jnp.arange(0, d_model, 2, dtype=jnp.float32) * (-math.log(10000.0) / d_model)
    )
    pe = jnp.zeros((seq_len, d_model), dtype=jnp.float32)
    pe = pe.at[:, 0::2].set(jnp.sin(position * div_term))
    pe = pe.at[:, 1::2].set(jnp.cos(position * div_term))
    return pe.astype(dtype)


def _pe_add_kernel(x_ref, pe_ref, o_ref):
    """Eval mode: out = x + pe. Blocks are (tb, tr, cols); pe block is (tr, cols)."""
    o_ref[...] = (x_ref[...] + pe_ref[...][None, :, :]).astype(o_ref.dtype)


def _pe_add_dropout_kernel(x_ref, pe_ref, u_ref, o_ref, *, dropout_p):
    """Training mode: inverted dropout with a precomputed uniform-[0,1) mask stream.

    Scale/select in f32 (free under the DMA-bound regime), cast once at store.
    """
    y = x_ref[...] + pe_ref[...][None, :, :]
    keep = u_ref[...] >= jnp.float32(dropout_p)
    scale = jnp.float32(1.0 / (1.0 - dropout_p))
    o_ref[...] = (y * jnp.where(keep, scale, jnp.float32(0.0))).astype(o_ref.dtype)


# ~2 MiB blocks: per-grid-step overhead (~0.35 us) amortizes; measured elementwise
# adds reach ~85% of HBM roofline at 1-4 MiB tiles. 2 MiB keeps the double-buffered
# footprint well inside v5e's 16 MiB scoped default and v7x's 64 MiB physical VMEM.
_TARGET_TILE_BYTES = 2 << 20


def _choose_tiles(batch: int, rows: int, cols: int, itemsize: int):
    """Pick (tb, tr): batch-tile and row-tile sizes. cdiv gridding handles remainders."""
    per_row = cols * itemsize
    slab = rows * per_row  # one batch element's (rows, cols) slab
    if slab >= _TARGET_TILE_BYTES:
        tb = 1
        tr = max(8, (_TARGET_TILE_BYTES // per_row) // 8 * 8)  # multiple of 8
        tr = min(tr, rows)
    else:
        # Small S*D: tile over batch so each DMA still moves ~2 MiB.
        tr = rows
        tb = max(1, _TARGET_TILE_BYTES // max(slab, 1))
        tb = min(tb, batch)
        # Keep >=2 grid steps when it is cheap so megacore (v7x: 2 TCs) can split
        # the grid, but only when each half still moves >=1 MiB.
        if tb >= batch and batch >= 2 and batch * slab >= (2 << 20):
            tb = -(-batch // 2)
    return tb, tr


def positional_encoding(x, pe, *, dropout_p: float = 0.0, rng_key=None):
    """x: (B, S, D); pe: (seq_len_max, D) in compute dtype. Returns x + pe[:S] (+ dropout)."""
    B, S, D = x.shape
    pe = pe.astype(x.dtype)                      # no-op when built via make_sinusoidal_pe
    pe_s = pe if pe.shape[0] == S else pe[:S]    # == self.pe[:, :x.shape[1], :]

    # Lane-dense layout: if D is not a 128-multiple but S*D is, flatten (S, D)
    # into (S*D//128, 128) so stores are full-width vst instead of masked.
    if D % 128 == 0 or (S * D) % 128 != 0:
        rows, cols = S, D
        # TODO(synk): when neither D nor S*D is a 128-multiple we accept masked
        # partial stores; padding D in the wrapper would cost an extra HBM pass.
    else:
        rows, cols = (S * D) // 128, 128
    x_r = x.reshape(B, rows, cols)
    pe_r = pe_s.reshape(rows, cols)

    itemsize = x.dtype.itemsize
    tb, tr = _choose_tiles(B, rows, cols, itemsize)
    grid = (pl.cdiv(rows, tr), pl.cdiv(B, tb))   # row-tiles outer, batch inner -> PE stays resident

    x_spec = pl.BlockSpec((tb, tr, cols), lambda s, b: (b, s, 0))
    pe_spec = pl.BlockSpec((tr, cols), lambda s, b: (s, 0))

    training_dropout = float(dropout_p) > 0.0
    if training_dropout:
        if rng_key is None:
            rng_key = jax.random.PRNGKey(0)
        # TODO(synk): pltpu.prng_seed/prng_random_bits have no interpret/CPU lowering
        # and torch's RNG stream cannot be reproduced anyway; the keep-mask comes from
        # a jax.random uniform array streamed alongside x (extra B*S*D f32 read,
        # training mode only). Semantics (mask + 1/(1-p) scaling) match nn.Dropout.
        u = jax.random.uniform(rng_key, x_r.shape, dtype=jnp.float32)
        kernel = functools.partial(_pe_add_dropout_kernel, dropout_p=float(dropout_p))
        in_specs = [x_spec, pe_spec, x_spec]     # uniform stream shares x's tiling
        args = (x_r, pe_r, u)
    else:
        kernel = _pe_add_kernel
        in_specs = [x_spec, pe_spec]
        args = (x_r, pe_r)

    # Explicit scoped-VMEM budget: x/out/(u) double-buffered + pe tile + slack.
    tile_bytes = tb * tr * cols * itemsize
    u_tile_bytes = tb * tr * cols * 4 if training_dropout else 0
    pe_tile_bytes = tr * cols * itemsize
    need = 4 * tile_bytes + 2 * u_tile_bytes + 2 * pe_tile_bytes + (2 << 20)
    vmem_limit = int(min(32 << 20, max(16 << 20, need)))

    out = pl.pallas_call(
        kernel,
        out_shape=jax.ShapeDtypeStruct((B, rows, cols), x.dtype),
        grid=grid,
        in_specs=in_specs,
        out_specs=x_spec,
        compiler_params=pltpu.CompilerParams(
            dimension_semantics=("parallel", "parallel"),
            vmem_limit_bytes=vmem_limit,
        ),
    )(*args)
    return out.reshape(B, S, D)


if __name__ == "__main__":
    key = jax.random.PRNGKey(0)
    k1, k2, k3, kd = jax.random.split(key, 4)

    # Case 1: module's demo config (D=32 < 128 -> lane-dense reshape path),
    # x.shape[1] < seq_len_max exercises the pe[:, :S, :] slice.
    d_model, seq_len_max = 32, 16
    batch, seq = 2, 8
    x1 = jax.random.normal(k1, (batch, seq, d_model), dtype=jnp.float32)
    pe1 = make_sinusoidal_pe(seq_len_max, d_model, dtype=x1.dtype)
    out1 = jax.block_until_ready(positional_encoding(x1, pe1, dropout_p=0.0))
    ref1 = x1 + pe1[None, :seq, :]
    assert out1.shape == (batch, seq, d_model)
    assert jnp.allclose(out1, ref1, atol=1e-6, rtol=1e-6)

    # Case 2: D a multiple of 128 (direct (S, D) tiling path), eval mode.
    d_model2, seq2 = 128, 16
    x2 = jax.random.normal(k2, (batch, seq2, d_model2), dtype=jnp.float32)
    pe2 = make_sinusoidal_pe(seq2, d_model2, dtype=x2.dtype)
    out2 = jax.block_until_ready(positional_encoding(x2, pe2, dropout_p=0.0))
    ref2 = x2 + pe2[None, :seq2, :]
    assert jnp.allclose(out2, ref2, atol=1e-6, rtol=1e-6)

    # Case 3: neither D nor S*D is a 128-multiple (masked-store fallback path).
    d_model3, seq3 = 24, 10
    x3 = jax.random.normal(k3, (batch, seq3, d_model3), dtype=jnp.float32)
    pe3 = make_sinusoidal_pe(seq3, d_model3, dtype=x3.dtype)
    out3 = jax.block_until_ready(positional_encoding(x3, pe3, dropout_p=0.0))
    ref3 = x3 + pe3[None, :seq3, :]
    assert jnp.allclose(out3, ref3, atol=1e-6, rtol=1e-6)

    # Training-mode dropout: entries are either 0 or (x+pe)/(1-p).
    p = 0.1
    out2d = jax.block_until_ready(
        positional_encoding(x2, pe2, dropout_p=p, rng_key=kd)
    )
    assert out2d.shape == x2.shape
    assert bool(jnp.all(jnp.isfinite(out2d)))
    dropped = jnp.isclose(out2d, 0.0)
    kept_ok = jnp.isclose(out2d, ref2 / (1.0 - p), atol=1e-5, rtol=1e-5)
    assert bool(jnp.all(dropped | kept_ok))

    print("KERNEL_OK")
</pallas_src>

<mosaic_0001>
module attributes {stable_mosaic.version = 11 : i64} {
  func.func @_pe_add_kernel(%arg0: i32, %arg1: i32, %arg2: memref<2x2x128xf32, #tpu.memory_space<vmem>>, %arg3: memref<2x128xf32, #tpu.memory_space<vmem>>, %arg4: memref<2x2x128xf32, #tpu.memory_space<vmem>>) attributes {dimension_semantics = [#tpu.dimension_semantics<parallel>, #tpu.dimension_semantics<parallel>], iteration_bounds = array<i64: 1, 1>, scalar_prefetch = 0 : i64, scratch_operands = 0 : i64, tpu.core_type = #tpu.core_type<tc>, window_params = [{transform_indices = @transform_0, window_bounds = array<i64: 2, 2, 128>}, {transform_indices = @transform_1, window_bounds = array<i64: 2, 128>}, {transform_indices = @transform_2, window_bounds = array<i64: 2, 2, 128>}]} {
    %c0 = arith.constant 0 : index
    %c0_0 = arith.constant 0 : index
    %c0_1 = arith.constant 0 : index
    %0 = vector.load %arg2[%c0, %c0_0, %c0_1] : memref<2x2x128xf32, #tpu.memory_space<vmem>>, vector<2x2x128xf32>
    %c0_2 = arith.constant 0 : index
    %c0_3 = arith.constant 0 : index
    %1 = vector.load %arg3[%c0_2, %c0_3] : memref<2x128xf32, #tpu.memory_space<vmem>>, vector<2x128xf32>
    %2 = vector.shape_cast %1 : vector<2x128xf32> to vector<1x2x128xf32>
    %3 = vector.broadcast %2 : vector<1x2x128xf32> to vector<2x2x128xf32>
    %4 = arith.addf %0, %3 : vector<2x2x128xf32>
    %c0_4 = arith.constant 0 : index
    %c0_5 = arith.constant 0 : index
    %c0_6 = arith.constant 0 : index
    %5 = vector.load %arg4[%c0_4, %c0_5, %c0_6] : memref<2x2x128xf32, #tpu.memory_space<vmem>>, vector<2x2x128xf32>
    tpu.vector_store %arg4[%c0_4, %c0_5, %c0_6], %4 {strides = array<i32>} : memref<2x2x128xf32, #tpu.memory_space<vmem>>, vector<2x2x128xf32>,
    return
  }
  func.func @transform_0(%arg0: i32, %arg1: i32) -> (i32, i32, i32) {
    %c0_i32 = arith.constant 0 : i32
    %c0_i32_0 = arith.constant 0 : i32
    return %arg1, %arg0, %c0_i32 : i32, i32, i32
  }
  func.func @transform_1(%arg0: i32, %arg1: i32) -> (i32, i32) {
    %c0_i32 = arith.constant 0 : i32
    %c0_i32_0 = arith.constant 0 : i32
    return %arg0, %c0_i32 : i32, i32
  }
  func.func @transform_2(%arg0: i32, %arg1: i32) -> (i32, i32, i32) {
    %c0_i32 = arith.constant 0 : i32
    %c0_i32_0 = arith.constant 0 : i32
    return %arg1, %arg0, %c0_i32 : i32, i32, i32
  }
}

</mosaic_0001>

<bundles_post_ra>
// kernel: tpu_custom_call.1
= control target key start
LH: loop header
LB: loop body
LE: loop exit
PB: predicated region body
PF: predicated region fallthrough
CT: control target
= control target key end

     0   :  { %7 = vsyncpa [#allocation3], 0  ;;  %s154_s0 = inlined_call_operand.hbm [shape: f32[2,2,128], index: 0, kind: input, shape index: {}]   ;;  %s155_s1 = inlined_call_operand.vmem [shape: f32[2,128], index: 1, kind: input, shape index: {}]   ;;  %s156_s2 = inlined_call_operand.hbm [shape: f32[2,2,128], index: 2, kind: output, shape index: {}]  }
   0x1   :  { %8 = vsyncpa [#allocation4], 0  ;;  %s102_s9 = smov [#allocation2]   ;;  %s54_s13 = scalar_lea.hbm %s154_s0, 64 }
   0x2   :  { %s14_s10 = sshll.u32 %s102_s9, 4  ;;  %p55_p0 = scmp.ne.s32.totalorder %s154_s0, %s54_s13  ;;  %s15_s10 = int_to_ptr.vmem [resolvable:$true] %s14_s10 }
   0x3   :  { %p58_p1 = scmp.lt.u32.totalorder %s54_s13, %s154_s0 }
   0x5   :  { %p60_p2 = pnand %p58_p1, %p55_p0 }
   0x7   :  { %63 = shalt.err (!%p60_p2)
}
   0x8   :  { %s64_s18 = scalar_lea.vmem %s15_s10, 64  ;;  %p69_p4 = scmp.lt.s32.totalorder %s15_s10, %s15_s10 }
   0x9   :  { %p65_p3 = scmp.ne.s32.totalorder %s15_s10, %s64_s18  ;;  %p70_p5 = scmp.lt.s32.totalorder %s64_s18, %s64_s18 }
   0xb   :  { %p71_p6 = por %p70_p5, %p69_p4 }
   0xd   :  { %p72_p7 = pnand %p71_p6, %p65_p3 }
   0xf   :  { %75 = shalt.err (!%p72_p7)
}
  0x10   :  { %s103_s19 = smov 32   ;;  %s104_s20 = smov 2  }
  0x11   :  { %20 = dma.hbm_to_vmem [thread:$0]  %s154_s0, 64, %s15_s10, [#allocation3], %s103_s19, %s103_s19, %s104_s20  }
  0x12   :  { %98 = dma.done.wait [#allocation3], 64  }
  0x13   :  { %99 = vsyncadd [#allocation3], 4294967232  ;;  %s105_s23 = smov [#allocation5]   ;;  %v26_v0 = vld [vmem:[#allocation2] sm:$0x3] }
  0x14   :  { %s38_s24 = sshll.u32 %s105_s23, 4  ;;  %v28_v1 = vld [vmem:[%s155_s1] sm:$0x3]  ;;  %v27_v2 = vld [vmem:[#allocation2 + $0x2] sm:$0x3]  ;;  %s39_s24 = int_to_ptr.vmem [resolvable:$true] %s38_s24 }
  0x15   :  { %v29_v3 = vadd.f32 %v28_v1, %v26_v0  ;;  %v30_v4 = vadd.f32 %v28_v1, %v27_v2  ;;  %s76_s27 = scalar_lea.vmem %s39_s24, 64  ;;  %p81_p9 = scmp.lt.s32.totalorder %s39_s24, %s39_s24 }
  0x16   :  { %p77_p8 = scmp.ne.s32.totalorder %s39_s24, %s76_s27  ;;  %p82_p10 = scmp.lt.s32.totalorder %s76_s27, %s76_s27 }
  0x17   :  { %31 = vst [vmem:[#allocation5] sm:$0x3] %v29_v3  ;;  %32 = vst [vmem:[#allocation5 + $0x2] sm:$0x3] %v30_v4 }
  0x18   :  { %p83_p11 = por %p82_p10, %p81_p9 }
  0x1a   :  { %p84_p12 = pnand %p83_p11, %p77_p8 }
  0x1c   :  { %87 = shalt.err (!%p84_p12)
}
  0x1d   :  { %s88_s29 = scalar_lea.hbm %s156_s2, 64 }
  0x1e   :  { %p89_p13 = scmp.ne.s32.totalorder %s156_s2, %s88_s29  ;;  %p92_p0 = scmp.lt.u32.totalorder %s88_s29, %s156_s2 }
  0x20   :  { %p94_p1 = pnand %p92_p0, %p89_p13 }
  0x22   :  { %97 = shalt.err (!%p94_p1)
}
  0x23   :  { %44 = dma.vmem_to_hbm [thread:$0]  %s39_s24, 64, %s156_s2, [#allocation4], %s103_s19, %s103_s19, %s104_s20  }
  0x24   :  { %100 = dma.done.wait [#allocation4], 64  }
  0x25   :  { %101 = vsyncadd [#allocation4], 4294967232 }
  0x26   :  { %48 = vsyncpa [#allocation3], 1 }
  0x27   :  { %49 = vsyncpa [#allocation4], 1 }

</bundles_post_ra>
